<compile_context>
chip_gen: v5e
topology: v5e:2x2
jax: 0.10.0
libtpu: 0.0.40
codegen_flags: <defaults>
</compile_context>

<pallas_src>
import jax
import jax.numpy as jnp
from jax import lax
from jax.experimental import pallas as pl
from jax.experimental.pallas import tpu as pltpu

_HALF_LOG_2PI = 0.9189385332046727  # 0.5 * ln(2*pi)


def _recip(x):
    """1/x via approx EUP vrcp + two Newton steps (refinement is VALU-only)."""
    r = pl.reciprocal(x, approx=True)
    r = r * (2.0 - x * r)
    r = r * (2.0 - x * r)
    return r


def _lgamma_digamma(x):
    """(ln Gamma(x), digamma(x)) elementwise for x > 0.

    Recurrence shift to z >= 6 tracking the shifted factors as a running
    product `den` (one log at the end, shared by lgamma) and the digamma shift
    sum rationally as num/den (one reciprocal at the end), then Stirling /
    asymptotic series.  EUP work: 2 logs + 2 approx reciprocals per element.
    """
    z = x
    num = jnp.zeros_like(x)   # digamma shift sum = num / den
    den = jnp.ones_like(x)    # product of shifted factors (< 6**6, no overflow)
    for _ in range(6):        # x > 0  =>  x + 6 > 6, so 6 shifts always suffice
        small = z < 6.0
        zw = jnp.where(small, z, 1.0)
        num = num * zw + jnp.where(small, den, 0.0)
        den = den * zw
        z = jnp.where(small, z + 1.0, z)
    log_z = jnp.log(z)
    log_den = jnp.log(den)
    zi = _recip(z)
    zi2 = zi * zi
    rsum = num * _recip(den)
    lg_series = zi * (1.0 / 12.0
                      + zi2 * (-1.0 / 360.0
                               + zi2 * (1.0 / 1260.0
                                        + zi2 * (-1.0 / 1680.0))))
    dg_series = zi2 * (1.0 / 12.0
                       + zi2 * (-1.0 / 120.0
                                + zi2 * (1.0 / 252.0)))
    lg = (z - 0.5) * log_z - z + _HALF_LOG_2PI + lg_series - log_den
    dg = log_z - 0.5 * zi - dg_series - rsum
    return lg, dg


def _kl_dirichlet_kernel(p_ref, q_ref, out_ref, pack_ref):
    # p_ref, q_ref: [TB, K] (any float dtype); out_ref: [1, 8, 128] f32;
    # pack_ref: [TB, round_up(2K+2, 128)] f32 scratch for lane-packing.
    p = p_ref[...].astype(jnp.float32)
    q = q_ref[...].astype(jnp.float32)
    k = p.shape[-1]

    sum_p = jnp.sum(p, axis=-1, keepdims=True)            # [TB, 1]
    sum_q = jnp.sum(q, axis=-1, keepdims=True)            # [TB, 1]

    # Lane-pack [p | q | sum_p | sum_q | 1.0 filler] so ONE transcendental pass
    # covers everything.  Filler of 1.0 keeps lgamma/digamma finite there.
    pack_ref[...] = jnp.ones(pack_ref.shape, jnp.float32)
    pack_ref[:, 0:k] = p
    pack_ref[:, k:2 * k] = q
    pack_ref[:, 2 * k:2 * k + 1] = sum_p
    pack_ref[:, 2 * k + 1:2 * k + 2] = sum_q

    lg_all, dg_all = _lgamma_digamma(pack_ref[...])        # [TB, PW]

    lane = lax.broadcasted_iota(jnp.int32, lg_all.shape, 1)
    in_p = lane < k
    in_q = (lane >= k) & (lane < 2 * k)
    zero = jnp.zeros_like(lg_all)

    # t2 = sum_k lgamma(p) - sum_k lgamma(q)  (iota-masked lane reductions)
    t2 = (jnp.sum(jnp.where(in_p, lg_all, zero), axis=-1, keepdims=True)
          - jnp.sum(jnp.where(in_q, lg_all, zero), axis=-1, keepdims=True))

    # Single-lane extraction of the sum-column results.
    lg_sp = jnp.sum(jnp.where(lane == 2 * k, lg_all, zero), axis=-1, keepdims=True)
    lg_sq = jnp.sum(jnp.where(lane == 2 * k + 1, lg_all, zero), axis=-1, keepdims=True)
    dg_sp = jnp.sum(jnp.where(lane == 2 * k, dg_all, zero), axis=-1, keepdims=True)

    # sum_k (p - q) * digamma(p): reuse pack_ref as the (p - q) weight buffer
    # (zeros everywhere else), so the multiply stays in the packed layout.
    pack_ref[...] = zero
    pack_ref[:, 0:k] = p - q
    s34 = jnp.sum(dg_all * pack_ref[...], axis=-1, keepdims=True)

    t1 = lg_sp - lg_sq
    # sum_k (p-q)*(digamma(p) - digamma(sum_p))
    #   = sum_k (p-q)*digamma(p) - digamma(sum_p)*(sum_p - sum_q)
    t34 = s34 - dg_sp * (sum_p - sum_q)
    kl = t1 - t2 + t34                                     # [TB, 1]

    # Per-block partial sum, broadcast lane-dense into this block's output tile.
    out_ref[...] = jnp.full(out_ref.shape, jnp.sum(kl), dtype=jnp.float32)


def _round_up(x, m):
    return ((x + m - 1) // m) * m


def kl_loss(model_concentrations, target_concentrations, mode="reverse"):
    """Pallas equivalent of KlLoss.forward: mean KL(Dirichlet || Dirichlet)."""
    if mode == "forward":
        p, q = target_concentrations, model_concentrations
    else:  # 'reverse' (default)
        p, q = model_concentrations, target_concentrations

    # Flatten any leading batch dims; last dim is the Dirichlet event (class) dim.
    k = p.shape[-1]
    p = p.reshape(-1, k)
    q = q.reshape(-1, k)
    b = p.shape[0]

    kp = _round_up(k, 128)            # lane-padded width of a [TB, K] VMEM tile
    pw = _round_up(2 * k + 2, 128)    # packed scratch width
    itemsize = p.dtype.itemsize
    # 2 inputs x 2 pipeline buffers (lane padded) + f32 p/q copies + ~12
    # packed-width f32 temporaries (scratch, lg/dg, shift-loop live values).
    bytes_per_row = 2 * 2 * kp * itemsize + (2 * kp + 12 * pw) * 4
    # ~24 MiB tile budget: fits v7x's 64 MiB VMEM with headroom, bigger tiles
    # on v5e/v6e amortize the ~0.35 us per-grid-step overhead.
    tb = max(8, min(2048, (24 * 1024 * 1024 // bytes_per_row) // 8 * 8))
    b8 = _round_up(b, 8)
    if b8 >= 16:
        # Guarantee >= 2 grid blocks so v7x's two TensorCores both get work.
        tb = min(tb, _round_up((b8 + 1) // 2, 8))
    tb = min(tb, b8)
    b_pad = _round_up(b, tb)
    if b_pad != b:
        # Pad BOTH tensors with concentration-1.0 rows -> their KL is exactly 0.
        pad = ((0, b_pad - b), (0, 0))
        p = jnp.pad(p, pad, constant_values=1.0)
        q = jnp.pad(q, pad, constant_values=1.0)

    grid = (b_pad // tb,)
    cost = pl.CostEstimate(
        flops=int(80 * b_pad * (2 * k + 2)),
        transcendentals=int(4 * b_pad * (2 * k + 2)),
        bytes_accessed=int(2 * b_pad * k * itemsize + grid[0] * 8 * 128 * 4),
    )

    partials = pl.pallas_call(
        _kl_dirichlet_kernel,
        out_shape=jax.ShapeDtypeStruct((grid[0], 8, 128), jnp.float32),
        grid_spec=pltpu.PrefetchScalarGridSpec(
            num_scalar_prefetch=0,
            grid=grid,
            in_specs=[
                pl.BlockSpec((tb, k), lambda i: (i, 0)),
                pl.BlockSpec((tb, k), lambda i: (i, 0)),
            ],
            out_specs=pl.BlockSpec((1, 8, 128), lambda i: (i, 0, 0)),
            scratch_shapes=[pltpu.VMEM((tb, pw), jnp.float32)],
        ),
        compiler_params=pltpu.CompilerParams(
            dimension_semantics=("parallel",),       # megacore sharding on v7x
            vmem_limit_bytes=48 * 1024 * 1024,
        ),
        cost_estimate=cost,
    )(p, q)

    # Finish the mean with exactly one division by the TRUE batch size.
    return jnp.sum(partials[:, 0, 0]) / jnp.float32(b)


def _kl_loss_ref(model_concentrations, target_concentrations, mode="reverse"):
    """Pure-JAX reference (mirrors torch._kl_dirichlet_dirichlet + mean)."""
    from jax.scipy.special import gammaln, digamma
    if mode == "forward":
        p, q = target_concentrations, model_concentrations
    else:
        p, q = model_concentrations, target_concentrations
    p = p.astype(jnp.float32)
    q = q.astype(jnp.float32)
    sp = p.sum(-1)
    sq = q.sum(-1)
    t1 = gammaln(sp) - gammaln(sq)
    t2 = (gammaln(p) - gammaln(q)).sum(-1)
    t3 = p - q
    t4 = digamma(p) - digamma(sp)[..., None]
    return jnp.mean(t1 - t2 + (t3 * t4).sum(-1))


if __name__ == "__main__":
    key = jax.random.PRNGKey(0)
    k1, k2 = jax.random.split(key)
    B, K = 8, 16  # batch of 8 Dirichlet distributions over 16 classes
    # Concentrations must be strictly positive.
    model_conc = jax.random.uniform(k1, (B, K), jnp.float32, minval=0.5, maxval=5.0)
    target_conc = jax.random.uniform(k2, (B, K), jnp.float32, minval=0.5, maxval=5.0)

    loss = jax.block_until_ready(kl_loss(model_conc, target_conc, mode="reverse"))
    ref = _kl_loss_ref(model_conc, target_conc, mode="reverse")
    assert jnp.isfinite(loss), "loss is not finite"
    assert jnp.allclose(loss, ref, rtol=1e-4, atol=1e-4), (loss, ref)

    # Ragged batch exercises the zero-KL padding path.
    loss6 = jax.block_until_ready(kl_loss(model_conc[:6], target_conc[:6]))
    ref6 = _kl_loss_ref(model_conc[:6], target_conc[:6])
    assert jnp.isfinite(loss6), "ragged loss is not finite"
    assert jnp.allclose(loss6, ref6, rtol=1e-4, atol=1e-4), (loss6, ref6)

    # Forward mode path.
    lossf = jax.block_until_ready(kl_loss(model_conc, target_conc, mode="forward"))
    reff = _kl_loss_ref(model_conc, target_conc, mode="forward")
    assert jnp.isfinite(lossf), "forward loss is not finite"
    assert jnp.allclose(lossf, reff, rtol=1e-4, atol=1e-4), (lossf, reff)

    print("KERNEL_OK")
</pallas_src>

<mosaic_0001>
module attributes {stable_mosaic.version = 11 : i64} {
  func.func @_kl_dirichlet_kernel(%arg0: i32, %arg1: memref<8x16xf32, #tpu.memory_space<vmem>>, %arg2: memref<8x16xf32, #tpu.memory_space<vmem>>, %arg3: memref<1x8x128xf32, #tpu.memory_space<vmem>>, %arg4: memref<8x128xf32, #tpu.memory_space<vmem>>) attributes {dimension_semantics = [#tpu.dimension_semantics<parallel>], iteration_bounds = array<i64: 1>, scalar_prefetch = 0 : i64, scratch_operands = 1 : i64, tpu.core_type = #tpu.core_type<tc>, window_params = [{transform_indices = @transform_0, window_bounds = array<i64: 8, 16>}, {transform_indices = @transform_1, window_bounds = array<i64: 8, 16>}, {transform_indices = @transform_2, window_bounds = array<i64: 1, 8, 128>}]} {
    %c0 = arith.constant 0 : index
    %c0_0 = arith.constant 0 : index
    %0 = vector.load %arg1[%c0, %c0_0] : memref<8x16xf32, #tpu.memory_space<vmem>>, vector<8x16xf32>
    %c0_1 = arith.constant 0 : index
    %c0_2 = arith.constant 0 : index
    %1 = vector.load %arg2[%c0_1, %c0_2] : memref<8x16xf32, #tpu.memory_space<vmem>>, vector<8x16xf32>
    %cst = arith.constant dense<0.000000e+00> : vector<8xf32>
    %2 = vector.multi_reduction <add>, %0, %cst [1] : vector<8x16xf32> to vector<8xf32>
    %3 = vector.shape_cast %2 : vector<8xf32> to vector<8x1xf32>
    %cst_3 = arith.constant dense<0.000000e+00> : vector<8xf32>
    %4 = vector.multi_reduction <add>, %1, %cst_3 [1] : vector<8x16xf32> to vector<8xf32>
    %5 = vector.shape_cast %4 : vector<8xf32> to vector<8x1xf32>
    %cst_4 = arith.constant 1.000000e+00 : f32
    %6 = vector.broadcast %cst_4 : f32 to vector<8x128xf32>
    %c0_5 = arith.constant 0 : index
    %c0_6 = arith.constant 0 : index
    %7 = vector.load %arg4[%c0_5, %c0_6] : memref<8x128xf32, #tpu.memory_space<vmem>>, vector<8x128xf32>
    tpu.vector_store %arg4[%c0_5, %c0_6], %6 {strides = array<i32>} : memref<8x128xf32, #tpu.memory_space<vmem>>, vector<8x128xf32>,
    %c0_7 = arith.constant 0 : index
    %c0_8 = arith.constant 0 : index
    %8 = vector.load %arg4[%c0_7, %c0_8] : memref<8x128xf32, #tpu.memory_space<vmem>>, vector<8x16xf32>
    tpu.vector_store %arg4[%c0_7, %c0_8], %0 {strides = array<i32>} : memref<8x128xf32, #tpu.memory_space<vmem>>, vector<8x16xf32>,
    %c0_9 = arith.constant 0 : index
    %c16 = arith.constant 16 : index
    %9 = vector.load %arg4[%c0_9, %c16] : memref<8x128xf32, #tpu.memory_space<vmem>>, vector<8x16xf32>
    tpu.vector_store %arg4[%c0_9, %c16], %1 {strides = array<i32>} : memref<8x128xf32, #tpu.memory_space<vmem>>, vector<8x16xf32>,
    %c0_10 = arith.constant 0 : index
    %c32 = arith.constant 32 : index
    %10 = vector.load %arg4[%c0_10, %c32] : memref<8x128xf32, #tpu.memory_space<vmem>>, vector<8x1xf32>
    tpu.vector_store %arg4[%c0_10, %c32], %3 {strides = array<i32>} : memref<8x128xf32, #tpu.memory_space<vmem>>, vector<8x1xf32>,
    %c0_11 = arith.constant 0 : index
    %c33 = arith.constant 33 : index
    %11 = vector.load %arg4[%c0_11, %c33] : memref<8x128xf32, #tpu.memory_space<vmem>>, vector<8x1xf32>
    tpu.vector_store %arg4[%c0_11, %c33], %5 {strides = array<i32>} : memref<8x128xf32, #tpu.memory_space<vmem>>, vector<8x1xf32>,
    %c0_12 = arith.constant 0 : index
    %c0_13 = arith.constant 0 : index
    %12 = vector.load %arg4[%c0_12, %c0_13] : memref<8x128xf32, #tpu.memory_space<vmem>>, vector<8x128xf32>
    %cst_14 = arith.constant 0.000000e+00 : f32
    %13 = vector.broadcast %cst_14 : f32 to vector<8x128xf32>
    %cst_15 = arith.constant 1.000000e+00 : f32
    %14 = vector.broadcast %cst_15 : f32 to vector<8x128xf32>
    %cst_16 = arith.constant 6.000000e+00 : f32
    %15 = vector.broadcast %cst_16 : f32 to vector<8x128xf32>
    %16 = arith.cmpf olt, %12, %15 : vector<8x128xf32>
    %cst_17 = arith.constant 1.000000e+00 : f32
    %17 = vector.broadcast %cst_17 : f32 to vector<8x128xf32>
    %18 = arith.select %16, %12, %17 : vector<8x128xi1>, vector<8x128xf32>
    %19 = arith.mulf %13, %18 : vector<8x128xf32>
    %cst_18 = arith.constant 0.000000e+00 : f32
    %20 = vector.broadcast %cst_18 : f32 to vector<8x128xf32>
    %21 = arith.select %16, %14, %20 : vector<8x128xi1>, vector<8x128xf32>
    %22 = arith.addf %19, %21 : vector<8x128xf32>
    %23 = arith.mulf %14, %18 : vector<8x128xf32>
    %cst_19 = arith.constant 1.000000e+00 : f32
    %24 = vector.broadcast %cst_19 : f32 to vector<8x128xf32>
    %25 = arith.addf %12, %24 : vector<8x128xf32>
    %26 = arith.select %16, %25, %12 : vector<8x128xi1>, vector<8x128xf32>
    %cst_20 = arith.constant 6.000000e+00 : f32
    %27 = vector.broadcast %cst_20 : f32 to vector<8x128xf32>
    %28 = arith.cmpf olt, %26, %27 : vector<8x128xf32>
    %cst_21 = arith.constant 1.000000e+00 : f32
    %29 = vector.broadcast %cst_21 : f32 to vector<8x128xf32>
    %30 = arith.select %28, %26, %29 : vector<8x128xi1>, vector<8x128xf32>
    %31 = arith.mulf %22, %30 : vector<8x128xf32>
    %cst_22 = arith.constant 0.000000e+00 : f32
    %32 = vector.broadcast %cst_22 : f32 to vector<8x128xf32>
    %33 = arith.select %28, %23, %32 : vector<8x128xi1>, vector<8x128xf32>
    %34 = arith.addf %31, %33 : vector<8x128xf32>
    %35 = arith.mulf %23, %30 : vector<8x128xf32>
    %cst_23 = arith.constant 1.000000e+00 : f32
    %36 = vector.broadcast %cst_23 : f32 to vector<8x128xf32>
    %37 = arith.addf %26, %36 : vector<8x128xf32>
    %38 = arith.select %28, %37, %26 : vector<8x128xi1>, vector<8x128xf32>
    %cst_24 = arith.constant 6.000000e+00 : f32
    %39 = vector.broadcast %cst_24 : f32 to vector<8x128xf32>
    %40 = arith.cmpf olt, %38, %39 : vector<8x128xf32>
    %cst_25 = arith.constant 1.000000e+00 : f32
    %41 = vector.broadcast %cst_25 : f32 to vector<8x128xf32>
    %42 = arith.select %40, %38, %41 : vector<8x128xi1>, vector<8x128xf32>
    %43 = arith.mulf %34, %42 : vector<8x128xf32>
    %cst_26 = arith.constant 0.000000e+00 : f32
    %44 = vector.broadcast %cst_26 : f32 to vector<8x128xf32>
    %45 = arith.select %40, %35, %44 : vector<8x128xi1>, vector<8x128xf32>
    %46 = arith.addf %43, %45 : vector<8x128xf32>
    %47 = arith.mulf %35, %42 : vector<8x128xf32>
    %cst_27 = arith.constant 1.000000e+00 : f32
    %48 = vector.broadcast %cst_27 : f32 to vector<8x128xf32>
    %49 = arith.addf %38, %48 : vector<8x128xf32>
    %50 = arith.select %40, %49, %38 : vector<8x128xi1>, vector<8x128xf32>
    %cst_28 = arith.constant 6.000000e+00 : f32
    %51 = vector.broadcast %cst_28 : f32 to vector<8x128xf32>
    %52 = arith.cmpf olt, %50, %51 : vector<8x128xf32>
    %cst_29 = arith.constant 1.000000e+00 : f32
    %53 = vector.broadcast %cst_29 : f32 to vector<8x128xf32>
    %54 = arith.select %52, %50, %53 : vector<8x128xi1>, vector<8x128xf32>
    %55 = arith.mulf %46, %54 : vector<8x128xf32>
    %cst_30 = arith.constant 0.000000e+00 : f32
    %56 = vector.broadcast %cst_30 : f32 to vector<8x128xf32>
    %57 = arith.select %52, %47, %56 : vector<8x128xi1>, vector<8x128xf32>
    %58 = arith.addf %55, %57 : vector<8x128xf32>
    %59 = arith.mulf %47, %54 : vector<8x128xf32>
    %cst_31 = arith.constant 1.000000e+00 : f32
    %60 = vector.broadcast %cst_31 : f32 to vector<8x128xf32>
    %61 = arith.addf %50, %60 : vector<8x128xf32>
    %62 = arith.select %52, %61, %50 : vector<8x128xi1>, vector<8x128xf32>
    %cst_32 = arith.constant 6.000000e+00 : f32
    %63 = vector.broadcast %cst_32 : f32 to vector<8x128xf32>
    %64 = arith.cmpf olt, %62, %63 : vector<8x128xf32>
    %cst_33 = arith.constant 1.000000e+00 : f32
    %65 = vector.broadcast %cst_33 : f32 to vector<8x128xf32>
    %66 = arith.select %64, %62, %65 : vector<8x128xi1>, vector<8x128xf32>
    %67 = arith.mulf %58, %66 : vector<8x128xf32>
    %cst_34 = arith.constant 0.000000e+00 : f32
    %68 = vector.broadcast %cst_34 : f32 to vector<8x128xf32>
    %69 = arith.select %64, %59, %68 : vector<8x128xi1>, vector<8x128xf32>
    %70 = arith.addf %67, %69 : vector<8x128xf32>
    %71 = arith.mulf %59, %66 : vector<8x128xf32>
    %cst_35 = arith.constant 1.000000e+00 : f32
    %72 = vector.broadcast %cst_35 : f32 to vector<8x128xf32>
    %73 = arith.addf %62, %72 : vector<8x128xf32>
    %74 = arith.select %64, %73, %62 : vector<8x128xi1>, vector<8x128xf32>
    %cst_36 = arith.constant 6.000000e+00 : f32
    %75 = vector.broadcast %cst_36 : f32 to vector<8x128xf32>
    %76 = arith.cmpf olt, %74, %75 : vector<8x128xf32>
    %cst_37 = arith.constant 1.000000e+00 : f32
    %77 = vector.broadcast %cst_37 : f32 to vector<8x128xf32>
    %78 = arith.select %76, %74, %77 : vector<8x128xi1>, vector<8x128xf32>
    %79 = arith.mulf %70, %78 : vector<8x128xf32>
    %cst_38 = arith.constant 0.000000e+00 : f32
    %80 = vector.broadcast %cst_38 : f32 to vector<8x128xf32>
    %81 = arith.select %76, %71, %80 : vector<8x128xi1>, vector<8x128xf32>
    %82 = arith.addf %79, %81 : vector<8x128xf32>
    %83 = arith.mulf %71, %78 : vector<8x128xf32>
    %cst_39 = arith.constant 1.000000e+00 : f32
    %84 = vector.broadcast %cst_39 : f32 to vector<8x128xf32>
    %85 = arith.addf %74, %84 : vector<8x128xf32>
    %86 = arith.select %76, %85, %74 : vector<8x128xi1>, vector<8x128xf32>
    %87 = math.log %86 : vector<8x128xf32>
    %88 = math.log %83 : vector<8x128xf32>
    %89 = tpu.reciprocal %86 {approx = true} : vector<8x128xf32> -> vector<8x128xf32>
    %90 = arith.mulf %86, %89 : vector<8x128xf32>
    %cst_40 = arith.constant 2.000000e+00 : f32
    %91 = vector.broadcast %cst_40 : f32 to vector<8x128xf32>
    %92 = arith.subf %91, %90 : vector<8x128xf32>
    %93 = arith.mulf %89, %92 : vector<8x128xf32>
    %94 = arith.mulf %86, %93 : vector<8x128xf32>
    %cst_41 = arith.constant 2.000000e+00 : f32
    %95 = vector.broadcast %cst_41 : f32 to vector<8x128xf32>
    %96 = arith.subf %95, %94 : vector<8x128xf32>
    %97 = arith.mulf %93, %96 : vector<8x128xf32>
    %98 = arith.mulf %97, %97 : vector<8x128xf32>
    %99 = tpu.reciprocal %83 {approx = true} : vector<8x128xf32> -> vector<8x128xf32>
    %100 = arith.mulf %83, %99 : vector<8x128xf32>
    %cst_42 = arith.constant 2.000000e+00 : f32
    %101 = vector.broadcast %cst_42 : f32 to vector<8x128xf32>
    %102 = arith.subf %101, %100 : vector<8x128xf32>
    %103 = arith.mulf %99, %102 : vector<8x128xf32>
    %104 = arith.mulf %83, %103 : vector<8x128xf32>
    %cst_43 = arith.constant 2.000000e+00 : f32
    %105 = vector.broadcast %cst_43 : f32 to vector<8x128xf32>
    %106 = arith.subf %105, %104 : vector<8x128xf32>
    %107 = arith.mulf %103, %106 : vector<8x128xf32>
    %108 = arith.mulf %82, %107 : vector<8x128xf32>
    %cst_44 = arith.constant -5.95238118E-4 : f32
    %109 = vector.broadcast %cst_44 : f32 to vector<8x128xf32>
    %110 = arith.mulf %98, %109 : vector<8x128xf32>
    %cst_45 = arith.constant 7.93650805E-4 : f32
    %111 = vector.broadcast %cst_45 : f32 to vector<8x128xf32>
    %112 = arith.addf %111, %110 : vector<8x128xf32>
    %113 = arith.mulf %98, %112 : vector<8x128xf32>
    %cst_46 = arith.constant -0.00277777785 : f32
    %114 = vector.broadcast %cst_46 : f32 to vector<8x128xf32>
    %115 = arith.addf %114, %113 : vector<8x128xf32>
    %116 = arith.mulf %98, %115 : vector<8x128xf32>
    %cst_47 = arith.constant 0.0833333358 : f32
    %117 = vector.broadcast %cst_47 : f32 to vector<8x128xf32>
    %118 = arith.addf %117, %116 : vector<8x128xf32>
    %119 = arith.mulf %97, %118 : vector<8x128xf32>
    %cst_48 = arith.constant 0.0039682542 : f32
    %120 = vector.broadcast %cst_48 : f32 to vector<8x128xf32>
    %121 = arith.mulf %98, %120 : vector<8x128xf32>
    %cst_49 = arith.constant -0.00833333377 : f32
    %122 = vector.broadcast %cst_49 : f32 to vector<8x128xf32>
    %123 = arith.addf %122, %121 : vector<8x128xf32>
    %124 = arith.mulf %98, %123 : vector<8x128xf32>
    %cst_50 = arith.constant 0.0833333358 : f32
    %125 = vector.broadcast %cst_50 : f32 to vector<8x128xf32>
    %126 = arith.addf %125, %124 : vector<8x128xf32>
    %127 = arith.mulf %98, %126 : vector<8x128xf32>
    %cst_51 = arith.constant 5.000000e-01 : f32
    %128 = vector.broadcast %cst_51 : f32 to vector<8x128xf32>
    %129 = arith.subf %86, %128 : vector<8x128xf32>
    %130 = arith.mulf %129, %87 : vector<8x128xf32>
    %131 = arith.subf %130, %86 : vector<8x128xf32>
    %cst_52 = arith.constant 0.918938517 : f32
    %132 = vector.broadcast %cst_52 : f32 to vector<8x128xf32>
    %133 = arith.addf %131, %132 : vector<8x128xf32>
    %134 = arith.addf %133, %119 : vector<8x128xf32>
    %135 = arith.subf %134, %88 : vector<8x128xf32>
    %cst_53 = arith.constant 5.000000e-01 : f32
    %136 = vector.broadcast %cst_53 : f32 to vector<8x128xf32>
    %137 = arith.mulf %136, %97 : vector<8x128xf32>
    %138 = arith.subf %87, %137 : vector<8x128xf32>
    %139 = arith.subf %138, %127 : vector<8x128xf32>
    %140 = arith.subf %139, %108 : vector<8x128xf32>
    %141 = tpu.iota {dimensions = array<i32: 1>} : vector<8x128xi32>
    %c16_i32 = arith.constant 16 : i32
    %142 = vector.broadcast %c16_i32 : i32 to vector<8x128xi32>
    %143 = arith.cmpi slt, %141, %142 : vector<8x128xi32>
    %c16_i32_54 = arith.constant 16 : i32
    %144 = vector.broadcast %c16_i32_54 : i32 to vector<8x128xi32>
    %145 = arith.cmpi sge, %141, %144 : vector<8x128xi32>
    %c32_i32 = arith.constant 32 : i32
    %146 = vector.broadcast %c32_i32 : i32 to vector<8x128xi32>
    %147 = arith.cmpi slt, %141, %146 : vector<8x128xi32>
    %148 = arith.andi %145, %147 : vector<8x128xi1>
    %cst_55 = arith.constant 0.000000e+00 : f32
    %149 = vector.broadcast %cst_55 : f32 to vector<8x128xf32>
    %150 = arith.select %143, %135, %149 : vector<8x128xi1>, vector<8x128xf32>
    %cst_56 = arith.constant dense<0.000000e+00> : vector<8xf32>
    %151 = vector.multi_reduction <add>, %150, %cst_56 [1] : vector<8x128xf32> to vector<8xf32>
    %152 = vector.shape_cast %151 : vector<8xf32> to vector<8x1xf32>
    %153 = arith.select %148, %135, %149 : vector<8x128xi1>, vector<8x128xf32>
    %cst_57 = arith.constant dense<0.000000e+00> : vector<8xf32>
    %154 = vector.multi_reduction <add>, %153, %cst_57 [1] : vector<8x128xf32> to vector<8xf32>
    %155 = vector.shape_cast %154 : vector<8xf32> to vector<8x1xf32>
    %156 = arith.subf %152, %155 : vector<8x1xf32>
    %c32_i32_58 = arith.constant 32 : i32
    %157 = vector.broadcast %c32_i32_58 : i32 to vector<8x128xi32>
    %158 = arith.cmpi eq, %141, %157 : vector<8x128xi32>
    %159 = arith.select %158, %135, %149 : vector<8x128xi1>, vector<8x128xf32>
    %cst_59 = arith.constant dense<0.000000e+00> : vector<8xf32>
    %160 = vector.multi_reduction <add>, %159, %cst_59 [1] : vector<8x128xf32> to vector<8xf32>
    %161 = vector.shape_cast %160 : vector<8xf32> to vector<8x1xf32>
    %c33_i32 = arith.constant 33 : i32
    %162 = vector.broadcast %c33_i32 : i32 to vector<8x128xi32>
    %163 = arith.cmpi eq, %141, %162 : vector<8x128xi32>
    %164 = arith.select %163, %135, %149 : vector<8x128xi1>, vector<8x128xf32>
    %cst_60 = arith.constant dense<0.000000e+00> : vector<8xf32>
    %165 = vector.multi_reduction <add>, %164, %cst_60 [1] : vector<8x128xf32> to vector<8xf32>
    %166 = vector.shape_cast %165 : vector<8xf32> to vector<8x1xf32>
    %c32_i32_61 = arith.constant 32 : i32
    %167 = vector.broadcast %c32_i32_61 : i32 to vector<8x128xi32>
    %168 = arith.cmpi eq, %141, %167 : vector<8x128xi32>
    %169 = arith.select %168, %140, %149 : vector<8x128xi1>, vector<8x128xf32>
    %cst_62 = arith.constant dense<0.000000e+00> : vector<8xf32>
    %170 = vector.multi_reduction <add>, %169, %cst_62 [1] : vector<8x128xf32> to vector<8xf32>
    %171 = vector.shape_cast %170 : vector<8xf32> to vector<8x1xf32>
    %c0_63 = arith.constant 0 : index
    %c0_64 = arith.constant 0 : index
    %172 = vector.load %arg4[%c0_63, %c0_64] : memref<8x128xf32, #tpu.memory_space<vmem>>, vector<8x128xf32>
    tpu.vector_store %arg4[%c0_63, %c0_64], %149 {strides = array<i32>} : memref<8x128xf32, #tpu.memory_space<vmem>>, vector<8x128xf32>,
    %173 = arith.subf %0, %1 : vector<8x16xf32>
    %c0_65 = arith.constant 0 : index
    %c0_66 = arith.constant 0 : index
    %174 = vector.load %arg4[%c0_65, %c0_66] : memref<8x128xf32, #tpu.memory_space<vmem>>, vector<8x16xf32>
    tpu.vector_store %arg4[%c0_65, %c0_66], %173 {strides = array<i32>} : memref<8x128xf32, #tpu.memory_space<vmem>>, vector<8x16xf32>,
    %c0_67 = arith.constant 0 : index
    %c0_68 = arith.constant 0 : index
    %175 = vector.load %arg4[%c0_67, %c0_68] : memref<8x128xf32, #tpu.memory_space<vmem>>, vector<8x128xf32>
    %176 = arith.mulf %140, %175 : vector<8x128xf32>
    %cst_69 = arith.constant dense<0.000000e+00> : vector<8xf32>
    %177 = vector.multi_reduction <add>, %176, %cst_69 [1] : vector<8x128xf32> to vector<8xf32>
    %178 = vector.shape_cast %177 : vector<8xf32> to vector<8x1xf32>
    %179 = arith.subf %161, %166 : vector<8x1xf32>
    %180 = arith.subf %3, %5 : vector<8x1xf32>
    %181 = arith.mulf %171, %180 : vector<8x1xf32>
    %182 = arith.subf %178, %181 : vector<8x1xf32>
    %183 = arith.subf %179, %156 : vector<8x1xf32>
    %184 = arith.addf %183, %182 : vector<8x1xf32>
    %185 = vector.shape_cast %184 : vector<8x1xf32> to vector<1x8x1xf32>
    %cst_70 = arith.constant dense<0.000000e+00> : vector<1xf32>
    %186 = vector.multi_reduction <add>, %185, %cst_70 [1, 2] : vector<1x8x1xf32> to vector<1xf32>
    %187 = vector.shape_cast %186 : vector<1xf32> to vector<1x1x1xf32>
    %188 = vector.extract %187[0, 0, 0] : f32 from vector<1x1x1xf32>
    %189 = vector.broadcast %188 : f32 to vector<1x8x128xf32>
    %c0_71 = arith.constant 0 : index
    %c0_72 = arith.constant 0 : index
    %c0_73 = arith.constant 0 : index
    %190 = vector.load %arg3[%c0_71, %c0_72, %c0_73] : memref<1x8x128xf32, #tpu.memory_space<vmem>>, vector<1x8x128xf32>
    tpu.vector_store %arg3[%c0_71, %c0_72, %c0_73], %189 {strides = array<i32>} : memref<1x8x128xf32, #tpu.memory_space<vmem>>, vector<1x8x128xf32>,
    return
  }
  func.func @transform_0(%arg0: i32) -> (i32, i32) {
    %c0_i32 = arith.constant 0 : i32
    %c0_i32_0 = arith.constant 0 : i32
    return %arg0, %c0_i32 : i32, i32
  }
  func.func @transform_1(%arg0: i32) -> (i32, i32) {
    %c0_i32 = arith.constant 0 : i32
    %c0_i32_0 = arith.constant 0 : i32
    return %arg0, %c0_i32 : i32, i32
  }
  func.func @transform_2(%arg0: i32) -> (i32, i32, i32) {
    %c0_i32 = arith.constant 0 : i32
    %c0_i32_0 = arith.constant 0 : i32
    %c0_i32_1 = arith.constant 0 : i32
    return %arg0, %c0_i32, %c0_i32_0 : i32, i32, i32
  }
}

</mosaic_0001>

<bundles_post_ra>
// kernel: tpu_custom_call.1
= control target key start
LH: loop header
LB: loop body
LE: loop exit
PB: predicated region body
PF: predicated region fallthrough
CT: control target
= control target key end

     0   :  { %7 = vsyncpa [#allocation4], 0  ;;  %s396_s0 = inlined_call_operand.hbm [shape: f32[8,16], index: 0, kind: input, shape index: {}]   ;;  %s397_s1 = inlined_call_operand.hbm [shape: f32[8,16], index: 1, kind: input, shape index: {}]   ;;  %s398_s2 = inlined_call_operand.hbm [shape: f32[1,8,128], index: 2, kind: output, shape index: {}]  }
   0x1   :  { %8 = vsyncpa [#allocation7], 0 }
   0x2   :  { %9 = vsyncpa [#allocation5], 0  ;;  %s15_s11 = sshll.u32 %s396_s0, 4  ;;  %s314_s12 = smov [#allocation3]   ;;  %s16_s11 = int_to_ptr.hbm [resolvable:$true] %s15_s11 }
   0x3   :  { %s17_s13 = sshll.u32 %s314_s12, 4  ;;  %s26_s16 = sshll.u32 %s397_s1, 4  ;;  %s18_s13 = int_to_ptr.vmem [resolvable:$true] %s17_s13  ;;  %s27_s16 = int_to_ptr.hbm [resolvable:$true] %s26_s16 }
   0x4   :  { %20 = dma.hbm_to_vmem [thread:$0]  %s16_s11, 128, %s18_s13, [#allocation4]  }
   0x5   :  { %s315_s17 = smov [#allocation6]  }
   0x6   :  { %s28_s18 = sshll.u32 %s315_s17, 4  ;;  %s29_s18 = int_to_ptr.vmem [resolvable:$true] %s28_s18 }
   0x7   :  { %31 = dma.hbm_to_vmem [thread:$0]  %s27_s16, 128, %s29_s18, [#allocation7]  }
   0x8   :  { %308 = dma.done.wait [#allocation4], 128  }
   0x9   :  { %309 = vsyncadd [#allocation4], 4294967168 }
   0xa   :  { %310 = dma.done.wait [#allocation7], 128  }
   0xb   :  { %311 = vsyncadd [#allocation7], 4294967168  ;;  %v316_v0 = vmov 1.0   ;;  %vm42_vm0 = vcmask 130048   ;;  %v41_v1 = vld [vmem:[#allocation6] sm:$0xff]  ;;  %v40_v2 = vld [vmem:[#allocation3] sm:$0xff]  ;;  %v151_v63 = vlaneseq }
   0xc   :  { %49 = vst [vmem:[#allocation2] sm:$0xff] %v316_v0  ;;  %v46_v3 = vsel %vm42_vm0, %v41_v1, 0.0  ;;  %v43_v4 = vsel %vm42_vm0, %v40_v2, 0.0  ;;  %v176_v5 = vsub.f32 %v40_v2, %v41_v1  ;;  %s317_s0 = smov 16   ;;  %vm55_vm1 = vcmask 261248   ;;  %s319_s1 = smov [#allocation8]  }
   0xd   :  { %50 = vst.msk [vmem:[#allocation2] sm:$0xff] %vm42_vm0, %v40_v2  ;;  %47 = vadd.xlane.f32.xlu1 %v46_v3  ;;  %44 = vadd.xlane.f32.xlu0 %v43_v4  ;;  %vm57_vm2 = vcmask 269568   ;;  %vm59_vm3 = vcmask 277768   ;;  %v318_v11 = vmov 0.0   ;;  %s206_s19 = sshll.u32 %s319_s1, 4  ;;  %s208_s22 = sshll.u32 %s398_s2, 4  ;;  %s207_s19 = int_to_ptr.vmem [resolvable:$true] %s206_s19  ;;  %s209_s22 = int_to_ptr.hbm [resolvable:$true] %s208_s22 }
  0x21   :  { %52 = vrot.lane.b32.xlu0 %v41_v1, %s317_s0 }
  0x80   :  { %v344_v6 = vpop.xlane.xlu0 %44  ;;  %v346_v8 = vpop.xlane.xlu1 %47 }
  0x93   :  { %v53_v7 = vpop.permute.xlu0 %52 }
  0x94   :  { %56 = vst.msk [vmem:[#allocation2] sm:$0xff] %vm55_vm1, %v53_v7 }
  0x95   :  { %58 = vst.msk [vmem:[#allocation2] sm:$0xff] %vm57_vm2, %v344_v6 }
  0x96   :  { %60 = vst.msk [vmem:[#allocation2] sm:$0xff] %vm59_vm3, %v346_v8 }
  0x9d   :  { %v61_v9 = vld [vmem:[#allocation2] sm:$0xff] }
  0x9e   :  { %vm62_vm4 = vcmp.lt.f32.partialorder %v61_v9, 6.0  ;;  %v67_v10 = vadd.f32 1.0, %v61_v9  ;;  %175 = vst [vmem:[#allocation2] sm:$0xff] %v318_v11 }
  0x9f   :  { %177 = vst.msk [vmem:[#allocation2] sm:$0xff] %vm42_vm0, %v176_v5  ;;  %v63_v21 = vsel %vm62_vm4, %v61_v9, 1.0  ;;  %v65_v32 = vsel %vm62_vm4, 1.0, %v318_v11  ;;  %vm188_vm0 = vcmask 7168  }
  0xa0   :  { %v68_v12 = vsel %vm62_vm4, %v67_v10, %v61_v9  ;;  %v64_v29 = vmul.f32 0.0, %v63_v21  ;;  %v152_v9 = vand.u32 127, %v151_v63 }
  0xa1   :  { %vm69_vm5 = vcmp.lt.f32.partialorder %v68_v12, 6.0  ;;  %v75_v13 = vadd.f32 1.0, %v68_v12 }
  0xa2   :  { %v70_v19 = vsel %vm69_vm5, %v68_v12, 1.0  ;;  %v66_v34 = vadd.f32 %v65_v32, %v64_v29  ;;  %v72_v43 = vsel %vm69_vm5, %v63_v21, 0.0  ;;  %vm154_vm10 = vcmp.ge.s32.totalorder %v152_v9, 16 }
  0xa3   :  { %v76_v14 = vsel %vm69_vm5, %v75_v13, %v68_v12  ;;  %v74_v23 = vmul.f32 %v70_v19, %v63_v21  ;;  %vm155_vm11 = vcmp.lt.s32.totalorder %v152_v9, 32  ;;  %vm153_vm13 = vcmp.lt.s32.totalorder %v152_v9, 16 }
  0xa4   :  { %vm77_vm6 = vcmp.lt.f32.partialorder %v76_v14, 6.0  ;;  %v83_v15 = vadd.f32 1.0, %v76_v14  ;;  %v71_v39 = vmul.f32 %v70_v19, %v66_v34  ;;  %vm156_vm12 = vmand %vm154_vm10, %vm155_vm11  ;;  %vm168_vm14 = vcmp.eq.s32.totalorder %v152_v9, 33 }
  0xa5   :  { %v78_v25 = vsel %vm77_vm6, %v76_v14, 1.0  ;;  %v80_v53 = vsel %vm77_vm6, %v74_v23, 0.0  ;;  %vm164_vm15 = vcmp.eq.s32.totalorder %v152_v9, 32 }
  0xa6   :  { %v84_v16 = vsel %vm77_vm6, %v83_v15, %v76_v14  ;;  %v82_v27 = vmul.f32 %v78_v25, %v74_v23  ;;  %v73_v44 = vadd.f32 %v72_v43, %v71_v39 }
  0xa7   :  { %vm85_vm7 = vcmp.lt.f32.partialorder %v84_v16, 6.0  ;;  %v91_v17 = vadd.f32 1.0, %v84_v16 }
  0xa8   :  { %v86_v28 = vsel %vm85_vm7, %v84_v16, 1.0  ;;  %v79_v48 = vmul.f32 %v78_v25, %v73_v44  ;;  %v88_v3 = vsel %vm85_vm7, %v82_v27, 0.0 }
  0xa9   :  { %v355_v18 = vsel %vm85_vm7, %v91_v17, %v84_v16  ;;  %v90_v30 = vmul.f32 %v86_v28, %v82_v27 }
  0xaa   :  { %vm93_vm8 = vcmp.lt.f32.partialorder %v355_v18, 6.0  ;;  %v99_v20 = vadd.f32 1.0, %v355_v18  ;;  %v81_v54 = vadd.f32 %v80_v53, %v79_v48 }
  0xab   :  { %v94_v31 = vsel %vm93_vm8, %v355_v18, 1.0  ;;  %v96_v16 = vsel %vm93_vm8, %v90_v30, 0.0 }
  0xac   :  { %v364_v22 = vsel %vm93_vm8, %v99_v20, %v355_v18  ;;  %v377_v35 = vmul.f32 %v94_v31, %v90_v30  ;;  %v87_v60 = vmul.f32 %v86_v28, %v81_v54 }
  0xad   :  { %vm101_vm9 = vcmp.lt.f32.partialorder %v364_v22, 6.0  ;;  %v107_v24 = vadd.f32 1.0, %v364_v22 }
  0xae   :  { %v102_v37 = vsel %vm101_vm9, %v364_v22, 1.0  ;;  %v89_v4 = vadd.f32 %v88_v3, %v87_v60  ;;  %v104_v34 = vsel %vm101_vm9, %v377_v35, 0.0 }
  0xaf   :  { %v108_v26 = vsel %vm101_vm9, %v107_v24, %v364_v22  ;;  %v106_v40 = vmul.f32 %v102_v37, %v377_v35  ;;  %v183_v22 = vsub.f32 %v344_v6, %v346_v8 }
  0xb0   :  { %228 = vrcp.f32 %v108_v26  ;;  %v219_v56 = vadd.f32 -0.5, %v108_v26  ;;  %v95_v14 = vmul.f32 %v94_v31, %v89_v4 }
  0xb1   :  { %230 = vlog2.f32 %v108_v26 }
  0xb2   :  { %232 = vrcp.f32 %v106_v40  ;;  %v97_v23 = vadd.f32 %v96_v16, %v95_v14 }
  0xb3   :  { %234 = vlog2.f32 %v106_v40 }
  0xb4   :  { %v103_v29 = vmul.f32 %v102_v37, %v97_v23 }
  0xb6   :  { %v229_v33 = vpop.eup %228  ;;  %v105_v18 = vadd.f32 %v104_v34, %v103_v29 }
  0xb7   :  { %v114_v36 = vmul.f32 %v229_v33, %v108_v26  ;;  %v231_v47 = vpop.eup %230 }
  0xb8   :  { %v233_v50 = vpop.eup %232  ;;  %v110_v51 = vmul.f32 0.6931472, %v231_v47 }
  0xb9   :  { %v115_v38 = vsub.f32 2.0, %v114_v36  ;;  %v122_v57 = vmul.f32 %v233_v50, %v106_v40  ;;  %v235_v10 = vpop.eup %234 }
  0xba   :  { %v142_v59 = vmul.f32 %v219_v56, %v110_v51  ;;  %v112_v17 = vmul.f32 0.6931472, %v235_v10 }
  0xbb   :  { %v116_v41 = vmul.f32 %v229_v33, %v115_v38  ;;  %v123_v0 = vsub.f32 2.0, %v122_v57 }
  0xbc   :  { %v143_v2 = vsub.f32 %v142_v59, %v108_v26 }
  0xbd   :  { %v117_v42 = vmul.f32 %v116_v41, %v108_v26  ;;  %v124_v11 = vmul.f32 %v233_v50, %v123_v0 }
  0xbe   :  { %v144_v13 = vadd.f32 0.9189385, %v143_v2 }
  0xbf   :  { %v118_v45 = vsub.f32 2.0, %v117_v42  ;;  %v125_v20 = vmul.f32 %v124_v11, %v106_v40 }
  0xc1   :  { %v119_v46 = vmul.f32 %v118_v45, %v116_v41  ;;  %v126_v27 = vsub.f32 2.0, %v125_v20  ;;  %v178_v41 = vld [vmem:[#allocation2] sm:$0xff] }
  0xc3   :  { %v120_v49 = vmul.f32 %v119_v46, %v119_v46  ;;  %v147_v28 = vmul.f32 0.5, %v119_v46  ;;  %v127_v32 = vmul.f32 %v126_v27, %v124_v11 }
  0xc5   :  { %v129_v52 = vmul.f32 -0.0005952381, %v120_v49  ;;  %v136_v61 = vmul.f32 0.003968254, %v120_v49  ;;  %v148_v33 = vsub.f32 %v110_v51, %v147_v28  ;;  %v128_v39 = vmul.f32 %v127_v32, %v105_v18 }
  0xc7   :  { %v130_v55 = vadd.f32 0.0007936508, %v129_v52  ;;  %v137_v5 = vadd.f32 -0.008333334, %v136_v61 }
  0xc9   :  { %v131_v58 = vmul.f32 %v130_v55, %v120_v49  ;;  %v138_v15 = vmul.f32 %v137_v5, %v120_v49 }
  0xcb   :  { %v132_v62 = vadd.f32 -0.0027777778, %v131_v58  ;;  %v139_v24 = vadd.f32 0.083333336, %v138_v15 }
  0xcd   :  { %v133_v1 = vmul.f32 %v132_v62, %v120_v49  ;;  %v140_v31 = vmul.f32 %v139_v24, %v120_v49 }
  0xcf   :  { %v134_v7 = vadd.f32 0.083333336, %v133_v1  ;;  %v149_v30 = vsub.f32 %v148_v33, %v140_v31 }
  0xd1   :  { %v135_v12 = vmul.f32 %v134_v7, %v119_v46  ;;  %v150_v40 = vsub.f32 %v149_v30, %v128_v39 }
  0xd3   :  { %v145_v19 = vadd.f32 %v144_v13, %v135_v12  ;;  %v179_v42 = vmul.f32 %v178_v41, %v150_v40  ;;  %v172_v37 = vsel %vm164_vm15, %v150_v40, 0.0 }
  0xd5   :  { %v146_v21 = vsub.f32 %v145_v19, %v112_v17 }
  0xd7   :  { %v160_v25 = vsel %vm156_vm12, %v146_v21, 0.0  ;;  %v157_v26 = vsel %vm153_vm13, %v146_v21, 0.0  ;;  %v165_v36 = vsel %vm164_vm15, %v146_v21, 0.0  ;;  %v169_v38 = vsel %vm168_vm14, %v146_v21, 0.0 }
  0xd8   :  { %161 = vadd.xlane.f32.xlu2 %v160_v25  ;;  %158 = vadd.xlane.f32.xlu1 %v157_v26 }
  0xe0   :  { %166 = vadd.xlane.f32.xlu2 %v165_v36  ;;  %170 = vadd.xlane.f32.xlu1 %v169_v38 }
  0xe8   :  { %180 = vadd.xlane.f32.xlu1 %v179_v42  ;;  %173 = vadd.xlane.f32.xlu2 %v172_v37 }
 0x14b   :  { %v162_v43 = vpop.xlane.xlu2 %161  ;;  %v159_v44 = vpop.xlane.xlu1 %158 }
 0x14c   :  { %v163_v48 = vsub.f32 %v159_v44, %v162_v43 }
 0x153   :  { %v167_v45 = vpop.xlane.xlu2 %166  ;;  %v171_v46 = vpop.xlane.xlu1 %170 }
 0x154   :  { %v182_v35 = vsub.f32 %v167_v45, %v171_v46 }
 0x156   :  { %v186_v51 = vsub.f32 %v182_v35, %v163_v48 }
 0x15b   :  { %v174_v47 = vpop.xlane.xlu2 %173  ;;  %v181_v50 = vpop.xlane.xlu1 %180 }
 0x15c   :  { %v184_v49 = vmul.f32 %v183_v22, %v174_v47 }
 0x15e   :  { %v185_v52 = vsub.f32 %v181_v50, %v184_v49 }
 0x160   :  { %v187_v53 = vadd.f32 %v186_v51, %v185_v52 }
 0x162   :  { %v189_v54 = vsel %vm188_vm0, %v187_v53, 0.0 }
 0x163   :  { %190 = vadd.xlane.f32.xlu2 %v189_v54 }
 0x1d6   :  { %v191_v55 = vpop.xlane.xlu2 %190 }
 0x1d7   :  { %v192_v56 = vrot.slane %v191_v55, 4 }
 0x1d9   :  { %v193_v57 = vadd.f32 %v192_v56, %v191_v55 }
 0x1db   :  { %v194_v58 = vrot.slane %v193_v57, 2 }
 0x1dd   :  { %v195_v59 = vadd.f32 %v194_v58, %v193_v57 }
 0x1df   :  { %v196_v60 = vrot.slane %v195_v59, 1 }
 0x1e1   :  { %v197_v61 = vadd.f32 %v196_v60, %v195_v59 }
 0x1e3   :  { %220 = vpush %v197_v61 }
 0x214   :  { %s221_s23 = spop %220 }
 0x215   :  { %v199_v6 = vstv %s221_s23 }
 0x216   :  { %200 = vst [vmem:[#allocation8] sm:$0xff] %v199_v6 }
 0x217   :  { %211 = dma.vmem_to_hbm [thread:$0]  %s207_s19, 128, %s209_s22, [#allocation5]  }
 0x218   :  { %312 = dma.done.wait [#allocation5], 128  }
 0x219   :  { %313 = vsyncadd [#allocation5], 4294967168 }
 0x21a   :  { %216 = vsyncpa [#allocation4], 1 }
 0x21b   :  { %217 = vsyncpa [#allocation7], 1 }
 0x21c   :  { %218 = vsyncpa [#allocation5], 1 }

</bundles_post_ra>
